<compile_context>
chip_gen: v5e
topology: v5e:2x2
jax: 0.10.0
libtpu: 0.0.40
codegen_flags: <defaults>
</compile_context>

<pallas_src>
import functools

import jax
import jax.numpy as jnp
from jax.experimental import pallas as pl
from jax.experimental.pallas import tpu as pltpu


def _round_up(x, m):
    return (x + m - 1) // m * m


def _fused_mlp_kernel(x_ref, *args, num_layers):
    """Whole MLP on one row tile.

    x_ref : (TN, C_in)            compute dtype (bf16)   VMEM
    args  : w0, b0, ..., w_{L-1}, b_{L-1}, o_ref
            w_l   : (C_in_l, C_out_l)  compute dtype      VMEM (resident)
            b_l   : (1, C_out_l)       float32            VMEM (resident)
            o_ref : (TN, dim_out)      out dtype (bf16)   VMEM
    """
    o_ref = args[2 * num_layers]
    h = x_ref[...]                                   # bf16 activations
    for l in range(num_layers):
        w = args[2 * l][...]
        b = args[2 * l + 1][...]                     # (1, C_out) f32
        c_in = w.shape[0]
        if c_in <= 8:
            # Degenerate contraction dim: K/256 of the MXU would be almost
            # pure overhead, so do c_in broadcast multiply-adds on the VPU
            # with f32 accumulation, starting from the bias.
            hf = h.astype(jnp.float32)
            wf = w.astype(jnp.float32)
            y = b
            for k in range(c_in):
                y = y + hf[:, k:k + 1] * wf[k:k + 1, :]
        else:
            # MXU matmul, f32 accumulate; bias-add fused on the VPU.
            y = jnp.dot(h, w, preferred_element_type=jnp.float32) + b
        if l != num_layers - 1:
            # ReLU in f32 on the VPU, then back to bf16 for the next MXU dot.
            h = jnp.maximum(y, 0.0).astype(h.dtype)
        else:
            # Store only the real dim_out columns (no lane padding); bf16 cast
            # here halves the output HBM traffic.
            o_ref[...] = y.astype(o_ref.dtype)


def mlp_forward_pallas(x, params, *, block_rows=4096,
                       compute_dtype=jnp.bfloat16, out_dtype=jnp.bfloat16):
    """Fused MLP forward.

    x      : (N, dim_in) float array.
    params : list of (w, b) with w: (fan_in, fan_out), b: (fan_out,).
    Returns (N, dim_out) in out_dtype (default bf16).
    """
    n, dim_in = x.shape
    num_layers = len(params)
    dim_out = params[-1][0].shape[1]

    # Row tile: multiple of 16 (bf16 sublane packing); pad N up to a multiple.
    tn = min(block_rows, _round_up(max(n, 1), 16))
    # Guarantee >= 2 grid steps whenever N allows it so both v7x TensorCores
    # get work (no effect on v5e/v6e, which have a single TC).
    if n > 16:
        tn = min(tn, _round_up((n + 1) // 2, 16))
    n_pad = _round_up(n, tn)

    x_p = x.astype(compute_dtype)
    if n_pad != n:
        x_p = jnp.pad(x_p, ((0, n_pad - n), (0, 0)))

    flat_inputs = []
    in_specs = [pl.BlockSpec((tn, dim_in), lambda i: (i, 0))]
    for (w, b) in params:
        w_l = w.astype(compute_dtype)
        b_l = jnp.asarray(b).reshape(1, -1).astype(jnp.float32)
        flat_inputs += [w_l, b_l]
        # Constant index maps -> weights/biases stay resident in VMEM.
        in_specs += [pl.BlockSpec(w_l.shape, lambda i: (0, 0)),
                     pl.BlockSpec(b_l.shape, lambda i: (0, 0))]

    kernel = functools.partial(_fused_mlp_kernel, num_layers=num_layers)

    # VMEM budget per grid step (tn = 4096 worst case, 128-lane-padded tiles):
    #   x tile bf16  : 4096*128*2 B = 1 MiB  (x2 double-buffer)
    #   out tile bf16: 4096*128*2 B = 1 MiB  (x2 double-buffer)
    #   f32 (tn, 32/4) intermediates spilled 128-lane padded: ~2 MiB each
    # Total well under 48 MiB, which also leaves headroom on v7x's 64 MiB VMEM.
    out = pl.pallas_call(
        kernel,
        out_shape=jax.ShapeDtypeStruct((n_pad, dim_out), out_dtype),
        grid=(n_pad // tn,),
        in_specs=in_specs,
        out_specs=pl.BlockSpec((tn, dim_out), lambda i: (i, 0)),
        compiler_params=pltpu.CompilerParams(
            # Row tiles are independent: shard them across TensorCores (v7x).
            dimension_semantics=("parallel",),
            vmem_limit_bytes=48 * 1024 * 1024,
        ),
    )(x_p, *flat_inputs)

    return out[:n]


def init_mlp_params(key, dim_in, dim_out, dim_hidden, num_layers, bias=True):
    """PyTorch-style init: U(-k, k) with k = 1/sqrt(fan_in); weights stored
    transposed as (fan_in, fan_out), biases as (fan_out,)."""
    params = []
    for l in range(num_layers):
        fan_in = dim_in if l == 0 else dim_hidden
        fan_out = dim_out if l == num_layers - 1 else dim_hidden
        key, kw, kb = jax.random.split(key, 3)
        k = 1.0 / (fan_in ** 0.5)
        w = jax.random.uniform(kw, (fan_in, fan_out), jnp.float32, -k, k)
        if bias:
            b = jax.random.uniform(kb, (fan_out,), jnp.float32, -k, k)
        else:
            b = jnp.zeros((fan_out,), jnp.float32)
        params.append((w, b))
    return params


def mlp_forward_reference(x, params, compute_dtype=jnp.bfloat16,
                          out_dtype=jnp.bfloat16):
    """Pure-JAX reference with numerics matched to the kernel
    (bf16 weights/activations, f32 accumulate / bias / ReLU, bf16 output)."""
    num_layers = len(params)
    h = x.astype(compute_dtype)
    for l, (w, b) in enumerate(params):
        y = jnp.dot(h, w.astype(compute_dtype),
                    preferred_element_type=jnp.float32)
        y = y + jnp.asarray(b).reshape(1, -1).astype(jnp.float32)
        if l != num_layers - 1:
            h = jnp.maximum(y, 0.0).astype(compute_dtype)
        else:
            return y.astype(out_dtype)


if __name__ == "__main__":
    # Small shapes consistent with the NeRF grid-decoder MLP:
    # MLP(dim_in=4, dim_out=4, dim_hidden=32, num_layers=3)
    dim_in, dim_out, dim_hidden, num_layers = 4, 4, 32, 3
    n_points = 200  # not a multiple of the row tile (tests padding + 2-step grid)

    key = jax.random.PRNGKey(0)
    key, kx = jax.random.split(key)
    x = jax.random.normal(kx, (n_points, dim_in), jnp.float32)
    params = init_mlp_params(key, dim_in, dim_out, dim_hidden, num_layers)

    out = mlp_forward_pallas(x, params)
    out = jax.block_until_ready(out)

    ref = mlp_forward_reference(x, params)
    assert out.shape == (n_points, dim_out)
    err = jnp.max(jnp.abs(out.astype(jnp.float32) - ref.astype(jnp.float32)))
    assert jnp.allclose(out.astype(jnp.float32), ref.astype(jnp.float32),
                        atol=2e-2, rtol=2e-2), float(err)

    print("KERNEL_OK")
</pallas_src>

<mosaic_0001>
module attributes {stable_mosaic.version = 11 : i64} {
  func.func @_fused_mlp_kernel(%arg0: i32, %arg1: memref<112x4xbf16, #tpu.memory_space<vmem>>, %arg2: memref<4x32xbf16, #tpu.memory_space<vmem>>, %arg3: memref<1x32xf32, #tpu.memory_space<vmem>>, %arg4: memref<32x32xbf16, #tpu.memory_space<vmem>>, %arg5: memref<1x32xf32, #tpu.memory_space<vmem>>, %arg6: memref<32x4xbf16, #tpu.memory_space<vmem>>, %arg7: memref<1x4xf32, #tpu.memory_space<vmem>>, %arg8: memref<112x4xbf16, #tpu.memory_space<vmem>>) attributes {dimension_semantics = [#tpu.dimension_semantics<parallel>], iteration_bounds = array<i64: 2>, scalar_prefetch = 0 : i64, scratch_operands = 0 : i64, tpu.core_type = #tpu.core_type<tc>, window_params = [{transform_indices = @transform_0, window_bounds = array<i64: 112, 4>}, {pipeline_mode = #tpu.pipeline_mode<synchronous>, transform_indices = @transform_1, window_bounds = array<i64: 4, 32>}, {pipeline_mode = #tpu.pipeline_mode<synchronous>, transform_indices = @transform_2, window_bounds = array<i64: 1, 32>}, {pipeline_mode = #tpu.pipeline_mode<synchronous>, transform_indices = @transform_3, window_bounds = array<i64: 32, 32>}, {pipeline_mode = #tpu.pipeline_mode<synchronous>, transform_indices = @transform_4, window_bounds = array<i64: 1, 32>}, {pipeline_mode = #tpu.pipeline_mode<synchronous>, transform_indices = @transform_5, window_bounds = array<i64: 32, 4>}, {pipeline_mode = #tpu.pipeline_mode<synchronous>, transform_indices = @transform_6, window_bounds = array<i64: 1, 4>}, {transform_indices = @transform_7, window_bounds = array<i64: 112, 4>}]} {
    %c0 = arith.constant 0 : index
    %c0_0 = arith.constant 0 : index
    %0 = vector.load %arg1[%c0, %c0_0] : memref<112x4xbf16, #tpu.memory_space<vmem>>, vector<112x4xbf16>
    %c0_1 = arith.constant 0 : index
    %c0_2 = arith.constant 0 : index
    %1 = vector.load %arg2[%c0_1, %c0_2] : memref<4x32xbf16, #tpu.memory_space<vmem>>, vector<4x32xbf16>
    %c0_3 = arith.constant 0 : index
    %c0_4 = arith.constant 0 : index
    %2 = vector.load %arg3[%c0_3, %c0_4] : memref<1x32xf32, #tpu.memory_space<vmem>>, vector<1x32xf32>
    %3 = arith.extf %0 : vector<112x4xbf16> to vector<112x4xf32>
    %4 = arith.extf %1 : vector<4x32xbf16> to vector<4x32xf32>
    %5 = vector.extract_strided_slice %3 {offsets = [0, 0], sizes = [112, 1], strides = [1, 1]} : vector<112x4xf32> to vector<112x1xf32>
    %6 = vector.extract_strided_slice %4 {offsets = [0, 0], sizes = [1, 32], strides = [1, 1]} : vector<4x32xf32> to vector<1x32xf32>
    %7 = vector.broadcast %5 : vector<112x1xf32> to vector<112x32xf32>
    %8 = vector.broadcast %6 : vector<1x32xf32> to vector<112x32xf32>
    %9 = arith.mulf %7, %8 : vector<112x32xf32>
    %10 = vector.broadcast %2 : vector<1x32xf32> to vector<112x32xf32>
    %11 = arith.addf %10, %9 : vector<112x32xf32>
    %12 = vector.extract_strided_slice %3 {offsets = [0, 1], sizes = [112, 1], strides = [1, 1]} : vector<112x4xf32> to vector<112x1xf32>
    %13 = vector.extract_strided_slice %4 {offsets = [1, 0], sizes = [1, 32], strides = [1, 1]} : vector<4x32xf32> to vector<1x32xf32>
    %14 = vector.broadcast %12 : vector<112x1xf32> to vector<112x32xf32>
    %15 = vector.broadcast %13 : vector<1x32xf32> to vector<112x32xf32>
    %16 = arith.mulf %14, %15 : vector<112x32xf32>
    %17 = arith.addf %11, %16 : vector<112x32xf32>
    %18 = vector.extract_strided_slice %3 {offsets = [0, 2], sizes = [112, 1], strides = [1, 1]} : vector<112x4xf32> to vector<112x1xf32>
    %19 = vector.extract_strided_slice %4 {offsets = [2, 0], sizes = [1, 32], strides = [1, 1]} : vector<4x32xf32> to vector<1x32xf32>
    %20 = vector.broadcast %18 : vector<112x1xf32> to vector<112x32xf32>
    %21 = vector.broadcast %19 : vector<1x32xf32> to vector<112x32xf32>
    %22 = arith.mulf %20, %21 : vector<112x32xf32>
    %23 = arith.addf %17, %22 : vector<112x32xf32>
    %24 = vector.extract_strided_slice %3 {offsets = [0, 3], sizes = [112, 1], strides = [1, 1]} : vector<112x4xf32> to vector<112x1xf32>
    %25 = vector.extract_strided_slice %4 {offsets = [3, 0], sizes = [1, 32], strides = [1, 1]} : vector<4x32xf32> to vector<1x32xf32>
    %26 = vector.broadcast %24 : vector<112x1xf32> to vector<112x32xf32>
    %27 = vector.broadcast %25 : vector<1x32xf32> to vector<112x32xf32>
    %28 = arith.mulf %26, %27 : vector<112x32xf32>
    %29 = arith.addf %23, %28 : vector<112x32xf32>
    %cst = arith.constant 0.000000e+00 : f32
    %30 = vector.broadcast %cst : f32 to vector<112x32xf32>
    %31 = arith.maximumf %29, %30 : vector<112x32xf32>
    %32 = arith.truncf %31 : vector<112x32xf32> to vector<112x32xbf16>
    %c0_5 = arith.constant 0 : index
    %c0_6 = arith.constant 0 : index
    %33 = vector.load %arg4[%c0_5, %c0_6] : memref<32x32xbf16, #tpu.memory_space<vmem>>, vector<32x32xbf16>
    %c0_7 = arith.constant 0 : index
    %c0_8 = arith.constant 0 : index
    %34 = vector.load %arg5[%c0_7, %c0_8] : memref<1x32xf32, #tpu.memory_space<vmem>>, vector<1x32xf32>
    %cst_9 = arith.constant dense<0.000000e+00> : vector<112x32xf32>
    %35 = tpu.matmul %32, %33, %cst_9 {dimension_numbers = #tpu.dot_dimension_numbers<[1], [0], [0], [1], [0, 0, 1, 1], [], []>} : vector<112x32xbf16>, vector<32x32xbf16>, vector<112x32xf32> -> vector<112x32xf32>
    %36 = vector.broadcast %34 : vector<1x32xf32> to vector<112x32xf32>
    %37 = arith.addf %35, %36 : vector<112x32xf32>
    %cst_10 = arith.constant 0.000000e+00 : f32
    %38 = vector.broadcast %cst_10 : f32 to vector<112x32xf32>
    %39 = arith.maximumf %37, %38 : vector<112x32xf32>
    %40 = arith.truncf %39 : vector<112x32xf32> to vector<112x32xbf16>
    %c0_11 = arith.constant 0 : index
    %c0_12 = arith.constant 0 : index
    %41 = vector.load %arg6[%c0_11, %c0_12] : memref<32x4xbf16, #tpu.memory_space<vmem>>, vector<32x4xbf16>
    %c0_13 = arith.constant 0 : index
    %c0_14 = arith.constant 0 : index
    %42 = vector.load %arg7[%c0_13, %c0_14] : memref<1x4xf32, #tpu.memory_space<vmem>>, vector<1x4xf32>
    %cst_15 = arith.constant dense<0.000000e+00> : vector<112x4xf32>
    %43 = tpu.matmul %40, %41, %cst_15 {dimension_numbers = #tpu.dot_dimension_numbers<[1], [0], [0], [1], [0, 0, 1, 1], [], []>} : vector<112x32xbf16>, vector<32x4xbf16>, vector<112x4xf32> -> vector<112x4xf32>
    %44 = vector.broadcast %42 : vector<1x4xf32> to vector<112x4xf32>
    %45 = arith.addf %43, %44 : vector<112x4xf32>
    %46 = arith.truncf %45 : vector<112x4xf32> to vector<112x4xbf16>
    %c0_16 = arith.constant 0 : index
    %c0_17 = arith.constant 0 : index
    %47 = vector.load %arg8[%c0_16, %c0_17] : memref<112x4xbf16, #tpu.memory_space<vmem>>, vector<112x4xbf16>
    tpu.vector_store %arg8[%c0_16, %c0_17], %46 {strides = array<i32>} : memref<112x4xbf16, #tpu.memory_space<vmem>>, vector<112x4xbf16>,
    return
  }
  func.func @transform_0(%arg0: i32) -> (i32, i32) {
    %c0_i32 = arith.constant 0 : i32
    %c0_i32_0 = arith.constant 0 : i32
    return %arg0, %c0_i32 : i32, i32
  }
  func.func @transform_1(%arg0: i32) -> (i32, i32) {
    %c0_i32 = arith.constant 0 : i32
    %c0_i32_0 = arith.constant 0 : i32
    %c0_i32_1 = arith.constant 0 : i32
    return %c0_i32, %c0_i32_0 : i32, i32
  }
  func.func @transform_2(%arg0: i32) -> (i32, i32) {
    %c0_i32 = arith.constant 0 : i32
    %c0_i32_0 = arith.constant 0 : i32
    %c0_i32_1 = arith.constant 0 : i32
    return %c0_i32, %c0_i32_0 : i32, i32
  }
  func.func @transform_3(%arg0: i32) -> (i32, i32) {
    %c0_i32 = arith.constant 0 : i32
    %c0_i32_0 = arith.constant 0 : i32
    %c0_i32_1 = arith.constant 0 : i32
    return %c0_i32, %c0_i32_0 : i32, i32
  }
  func.func @transform_4(%arg0: i32) -> (i32, i32) {
    %c0_i32 = arith.constant 0 : i32
    %c0_i32_0 = arith.constant 0 : i32
    %c0_i32_1 = arith.constant 0 : i32
    return %c0_i32, %c0_i32_0 : i32, i32
  }
  func.func @transform_5(%arg0: i32) -> (i32, i32) {
    %c0_i32 = arith.constant 0 : i32
    %c0_i32_0 = arith.constant 0 : i32
    %c0_i32_1 = arith.constant 0 : i32
    return %c0_i32, %c0_i32_0 : i32, i32
  }
  func.func @transform_6(%arg0: i32) -> (i32, i32) {
    %c0_i32 = arith.constant 0 : i32
    %c0_i32_0 = arith.constant 0 : i32
    %c0_i32_1 = arith.constant 0 : i32
    return %c0_i32, %c0_i32_0 : i32, i32
  }
  func.func @transform_7(%arg0: i32) -> (i32, i32) {
    %c0_i32 = arith.constant 0 : i32
    %c0_i32_0 = arith.constant 0 : i32
    return %arg0, %c0_i32 : i32, i32
  }
}

</mosaic_0001>

<bundles_post_ra>
// kernel: tpu_custom_call.1
= control target key start
LH: loop header
LB: loop body
LE: loop exit
PB: predicated region body
PF: predicated region fallthrough
CT: control target
= control target key end

     0   :  { %s1280_s24 = smov 0   ;;  %s1489_s0 = inlined_call_operand.vmem [shape: bf16[224,4], index: 0, kind: input, shape index: {}]   ;;  %s1490_s1 = inlined_call_operand.vmem [shape: bf16[4,32], index: 1, kind: input, shape index: {}]   ;;  %s1491_s2 = inlined_call_operand.vmem [shape: f32[1,32], index: 2, kind: input, shape index: {}]   ;;  %s1492_s3 = inlined_call_operand.vmem [shape: bf16[32,32], index: 3, kind: input, shape index: {}]   ;;  %s1493_s4 = inlined_call_operand.vmem [shape: f32[1,32], index: 4, kind: input, shape index: {}]   ;;  %s1494_s5 = inlined_call_operand.vmem [shape: bf16[32,4], index: 5, kind: input, shape index: {}]   ;;  %s1495_s6 = inlined_call_operand.vmem [shape: f32[1,4], index: 6, kind: input, shape index: {}]   ;;  %s1496_s7 = inlined_call_operand.vmem [shape: bf16[224,4], index: 7, kind: output, shape index: {}]  }
   0x1 LB: > { %s969_s25 = sadd.s32 4294967295, %s1234_s24   ;;  %p973_p0 = scmp.ge.s32.totalorder %s1234_s24, 1  ;;  %s1234_s24 = sphi %s1280_s24, %s17_s24  }
   0x2   : > { %p238_p1 = scmp.lt.s32.totalorder %s1234_s24, 3 }
   0x4   : > { %p239_p2 = pnand %p973_p0, %p238_p1 }
   0x5   : > { %s270_s26 = smul.u32 (!%p239_p2), 14, %s969_s25 }
   0x6   : > { %242 = sbr.rel (%p239_p2) target bundleno = 513 (0x201), region = 48 }
   0x7   : > { %p271_p3 = scmp.lt.s32.totalorder (!%p239_p2), %s270_s26, 27 }
   0xb   : > { %v1236_v0 = vmov 1   ;;  %v1237_v1 = vmov 0   ;;  %s1498_s26 = smov (!%p271_p3, %s270_s26), 27  ;;  %v1238_v11 = vmov 2   ;;  %v1239_v14 = vmov 3   ;;  %v1009_v33 = vld [vmem:[%s1492_s3 + $0x8] sm:$0xff] }
   0xc   : > { %1062 = vset.pattern.permute.xlu0 %v1236_v0  ;;  %1074 = vset.pattern.permute.xlu1 %v1237_v1  ;;  %s974_s27 = sshll.u32 %s1498_s26, 2  ;;  %v1008_v35 = vld [vmem:[%s1492_s3] sm:$0xff]  ;;  %vm712_vm0 = vcmask 261120   ;;  %vm898_vm1 = vcmask 27648  }
   0xd   : > { %1086 = vset.pattern.permute.xlu2 %v1236_v0  ;;  %s1299_s30 = scalar_lea.vmem %s1489_s0, %s974_s27  ;;  %740 = vmatpush.bf16.msra.mxu0 %v1009_v33  ;;  %v297_v37 = vld [vmem:[%s1490_s1] sm:$0x3]  ;;  %s1456_s29 = scalar_lea.vmem %s1496_s7, %s974_s27 }
   0xe   : > { %v1043_v2 = vld [vmem:[%s1299_s30 + $0x20] sm:$0xff]   ;;  %v1040_v10 = vld [vmem:[%s1299_s30 + $0x8] sm:$0xff]   ;;  %v1045_v20 = vld [vmem:[%s1299_s30 + $0x30] sm:$0xff]   ;;  %1046 = vmatpush.bf16.msra.mxu2 %v1009_v33  ;;  %v313_v40 = vunpack.c.l.bf16 %v297_v37 }
   0xf   : > { %v1013_v3 = vld [vmem:[%s1299_s30] sm:$0xff]   ;;  %v1030_v4 = vunpack.c.l.bf16 %v1043_v2  ;;  %v1031_v5 = vunpack.c.h.bf16 %v1043_v2  ;;  %v1018_v12 = vunpack.c.l.bf16 %v1040_v10  ;;  %v1019_v13 = vunpack.c.h.bf16 %v1040_v10  ;;  %v1044_v16 = vld [vmem:[%s1299_s30 + $0x28] sm:$0xff]   ;;  %v1041_v24 = vld [vmem:[%s1299_s30 + $0x10] sm:$0xff]  }
  0x10   : > { %v1014_v6 = vunpack.c.l.bf16 %v1013_v3  ;;  %v1015_v7 = vunpack.c.h.bf16 %v1013_v3  ;;  %v1034_v17 = vunpack.c.l.bf16 %v1044_v16  ;;  %v1035_v18 = vunpack.c.h.bf16 %v1044_v16  ;;  %v1042_v28 = vld [vmem:[%s1299_s30 + $0x18] sm:$0xff]   ;;  %v1337_v56 = vld [vmem:[%s1491_s2] ss:$0 sm:$0xff] }
  0x11   : > { %v1075_v8 = vpack.i.bf16 %v1031_v5, %v1030_v4  ;;  %v1108_v15 = vpack.i.bf16 %v1019_v13, %v1018_v12  ;;  %v1038_v21 = vunpack.c.l.bf16 %v1045_v20  ;;  %v1039_v22 = vunpack.c.h.bf16 %v1045_v20  ;;  %741 = vmatpush.bf16.msra.mxu0 %v1008_v35 }
  0x12   : > { %v1063_v9 = vpack.i.bf16 %v1015_v7, %v1014_v6  ;;  %v1120_v19 = vpack.i.bf16 %v1035_v18, %v1034_v17  ;;  %v1022_v25 = vunpack.c.l.bf16 %v1041_v24  ;;  %v1023_v26 = vunpack.c.h.bf16 %v1041_v24  ;;  %1047 = vmatpush.bf16.msra.mxu2 %v1008_v35 }
  0x13   : > { %1076 = vperm.xlu1 %1074, %v1075_v8   ;;  %1088 = vperm.xlu2 %1086, %v1075_v8   ;;  %v1167_v23 = vpack.i.bf16 %v1039_v22, %v1038_v21  ;;  %v1026_v29 = vunpack.c.l.bf16 %v1042_v28  ;;  %v1027_v30 = vunpack.c.h.bf16 %v1042_v28  ;;  %v1328_v42 = vperm.slane %v313_v40, 0 }
  0x14   : > { %1064 = vperm.xlu0 %1062, %v1063_v9   ;;  %v1155_v27 = vpack.i.bf16 %v1023_v26, %v1022_v25  ;;  %v1330_v49 = vperm.slane %v313_v40, 1  ;;  %v1343_v61 = vperm.slane %v313_v40, 2 }
  0x15   : > { %v1202_v31 = vpack.i.bf16 %v1027_v30, %v1026_v29 }
  0x1b   : > { %1080 = vset.pattern.permute.xlu1 %v1238_v11  ;;  %1092 = vset.pattern.permute.xlu2 %v1239_v14 }
  0x1c   : > { %1068 = vset.pattern.permute.xlu0 %v1237_v1  ;;  %1082 = vperm.xlu1 %1080, %v1063_v9  }
  0x1d   : > { %1070 = vperm.xlu0 %1068, %v1063_v9   ;;  %1094 = vperm.xlu2 %1092, %v1063_v9  }
  0x24   : > { %1099 = vperm.xlu1 %1080, %v1075_v8  }
  0x25   : > { %1109 = vperm.xlu0 %1068, %v1108_v15   ;;  %1104 = vperm.xlu2 %1092, %v1075_v8  }
  0x2c   : > { %1113 = vset.pattern.permute.xlu1 %v1236_v0 }
  0x2d   : > { %1137 = vset.pattern.permute.xlu0 %v1239_v14  ;;  %1115 = vperm.xlu1 %1113, %v1108_v15  }
  0x2e   : > { %1139 = vperm.xlu0 %1137, %v1108_v15   ;;  %1119 = vset.pattern.permute.xlu2 %v1237_v1 }
  0x2f   : > { %1121 = vperm.xlu2 %1119, %v1120_v19  }
  0x35   : > { %1125 = vset.pattern.permute.xlu1 %v1238_v11 }
  0x36   : > { %1166 = vset.pattern.permute.xlu0 %v1237_v1  ;;  %1127 = vperm.xlu1 %1125, %v1108_v15  }
  0x37   : > { %1168 = vperm.xlu0 %1166, %v1167_v23   ;;  %1131 = vset.pattern.permute.xlu2 %v1236_v0 }
  0x38   : > { %1133 = vperm.xlu2 %1131, %v1120_v19  }
  0x3e   : > { %1144 = vperm.xlu1 %1125, %v1120_v19  }
  0x3f   : > { %1195 = vset.pattern.permute.xlu0 %v1239_v14 }
  0x40   : > { %1197 = vperm.xlu0 %1195, %v1167_v23   ;;  %1148 = vset.pattern.permute.xlu2 %v1239_v14 }
  0x41   : > { %1150 = vperm.xlu2 %1148, %v1120_v19  }
  0x46   : > { %1154 = vset.pattern.permute.xlu1 %v1237_v1 }
  0x47   : > { %1156 = vperm.xlu1 %1154, %v1155_v27  }
  0x49   : > { %1160 = vset.pattern.permute.xlu2 %v1236_v0 }
  0x4a   : > { %1162 = vperm.xlu2 %1160, %v1155_v27  }
  0x4f   : > { %1172 = vset.pattern.permute.xlu1 %v1238_v11 }
  0x50   : > { %1174 = vperm.xlu1 %1172, %v1155_v27  }
  0x52   : > { %1179 = vperm.xlu2 %1160, %v1167_v23  }
  0x58   : > { %1183 = vset.pattern.permute.xlu1 %v1239_v14 }
  0x59   : > { %1185 = vperm.xlu1 %1183, %v1155_v27  }
  0x5a   : > { %1189 = vset.pattern.permute.xlu2 %v1238_v11 }
  0x5b   : > { %1191 = vperm.xlu2 %1189, %v1167_v23  }
  0x61   : > { %1201 = vset.pattern.permute.xlu1 %v1237_v1  ;;  %v1347_v1 = vperm.slane %v313_v40, 3 }
  0x62   : > { %1203 = vperm.xlu1 %1201, %v1202_v31  }
  0x63   : > { %1207 = vset.pattern.permute.xlu2 %v1236_v0 }
  0x64   : > { %1209 = vperm.xlu2 %1207, %v1202_v31  }
  0x6a   : > { %1213 = vset.pattern.permute.xlu1 %v1238_v11 }
  0x6b   : > { %1215 = vperm.xlu1 %1213, %v1202_v31  }
  0x6c   : > { %1219 = vset.pattern.permute.xlu2 %v1239_v14 }
  0x6d   : > { %1221 = vperm.xlu2 %1219, %v1202_v31   ;;  %v1089_v32 = vpop.permute.xlu2 %1088 }
  0x6e   : > { %v1091_v52 = vunpack.i.h.bf16 %v1089_v32  ;;  %v1090_v53 = vunpack.i.l.bf16 %v1089_v32 }
  0x70   : > { %v482_v4 = vmul.f32 %v1091_v52, %v1330_v49  ;;  %v481_v5 = vmul.f32 %v1090_v53, %v1330_v49 }
  0x77   : > { %v1095_v34 = vpop.permute.xlu2 %1094 }
  0x78   : > { %v1097_v6 = vunpack.i.h.bf16 %v1095_v34  ;;  %v1096_v7 = vunpack.i.l.bf16 %v1095_v34 }
  0x7a   : > { %v644_v19 = vmul.f32 %v1097_v6, %v1347_v1  ;;  %v643_v20 = vmul.f32 %v1096_v7, %v1347_v1 }
  0x7f   : > { %v1105_v36 = vpop.permute.xlu2 %1104 }
  0x80   : > { %v1107_v15 = vunpack.i.h.bf16 %v1105_v36  ;;  %v1106_v16 = vunpack.i.l.bf16 %v1105_v36 }
  0x82   : > { %v652_v29 = vmul.f32 %v1107_v15, %v1347_v1  ;;  %v651_v30 = vmul.f32 %v1106_v16, %v1347_v1 }
  0x85   : > { %v1077_v38 = vpop.permute.xlu1 %1076 }
  0x86   : > { %v1065_v39 = vpop.permute.xlu0 %1064  ;;  %v1079_v43 = vunpack.i.h.bf16 %v1077_v38  ;;  %v1078_v44 = vunpack.i.l.bf16 %v1077_v38 }
  0x87   : > { %v1067_v45 = vunpack.i.h.bf16 %v1065_v39  ;;  %v1066_v46 = vunpack.i.l.bf16 %v1065_v39 }
  0x88   : > { %v394_v54 = vmul.f32 %v1079_v43, %v1328_v42  ;;  %v393_v55 = vmul.f32 %v1078_v44, %v1328_v42 }
  0x89   : > { %v1326_v41 = vpop.permute.xlu2 %1121  ;;  %v474_v57 = vmul.f32 %v1067_v45, %v1330_v49  ;;  %v473_v58 = vmul.f32 %v1066_v46, %v1330_v49 }
  0x8a   : > { %v411_v8 = vadd.f32 %v1337_v56, %v394_v54  ;;  %v410_v9 = vadd.f32 %v1337_v56, %v393_v55  ;;  %v1123_v55 = vunpack.i.l.bf16 %v1326_v41 }
  0x8c   : > { %v495_v23 = vadd.f32 %v481_v5, %v410_v9  ;;  %v496_v24 = vadd.f32 %v482_v4, %v411_v8  ;;  %v395_v4 = vmul.f32 %v1123_v55, %v1328_v42 }
  0x8e   : > { %v1083_v47 = vpop.permute.xlu1 %1082  ;;  %v412_v16 = vadd.f32 %v1337_v56, %v395_v4 }
  0x8f   : > { %v1071_v48 = vpop.permute.xlu0 %1070  ;;  %v1085_v62 = vunpack.i.h.bf16 %v1083_v47  ;;  %v1084_v63 = vunpack.i.l.bf16 %v1083_v47 }
  0x90   : > { %v1073_v50 = vunpack.i.h.bf16 %v1071_v48  ;;  %v1072_v51 = vunpack.i.l.bf16 %v1071_v48  ;;  %v1124_v48 = vunpack.i.h.bf16 %v1326_v41 }
  0x91   : > { %v559_v12 = vmul.f32 %v1085_v62, %v1343_v61  ;;  %v558_v13 = vmul.f32 %v1084_v63, %v1343_v61 }
  0x92   : > { %v386_v59 = vmul.f32 %v1073_v50, %v1328_v42  ;;  %v385_v60 = vmul.f32 %v1072_v51, %v1328_v42  ;;  %v1345_v0 = vpop.permute.xlu2 %1133 }
  0x93   : > { %v1136_v5 = vunpack.i.h.bf16 %v1345_v0  ;;  %v1135_v41 = vunpack.i.l.bf16 %v1345_v0 }
  0x94   : > { %v403_v2 = vadd.f32 %v1337_v56, %v386_v59  ;;  %v402_v3 = vadd.f32 %v1337_v56, %v385_v60 }
  0x95   : > { %v483_v0 = vmul.f32 %v1135_v41, %v1330_v49 }
  0x96   : > { %v487_v10 = vadd.f32 %v473_v58, %v402_v3  ;;  %v488_v11 = vadd.f32 %v474_v57, %v403_v2  ;;  %v1100_v14 = vpop.permute.xlu1 %1099  ;;  %v396_v58 = vmul.f32 %v1124_v48, %v1328_v42 }
  0x97   : > { %v1102_v17 = vunpack.i.h.bf16 %v1100_v14  ;;  %v1101_v18 = vunpack.i.l.bf16 %v1100_v14  ;;  %v1110_v33 = vpop.permute.xlu0 %1109 }
  0x98   : > { %v572_v21 = vadd.f32 %v558_v13, %v487_v10  ;;  %v573_v22 = vadd.f32 %v559_v12, %v488_v11  ;;  %v1112_v40 = vunpack.i.h.bf16 %v1110_v33  ;;  %v1111_v43 = vunpack.i.l.bf16 %v1110_v33 }
  0x99   : > { %v567_v25 = vmul.f32 %v1102_v17, %v1343_v61  ;;  %v566_v26 = vmul.f32 %v1101_v18, %v1343_v61  ;;  %v413_v9 = vadd.f32 %v1337_v56, %v396_v58  ;;  %v484_v17 = vmul.f32 %v1136_v5, %v1330_v49 }
  0x9a   : > { %v657_v27 = vadd.f32 %v643_v20, %v572_v21  ;;  %v658_v28 = vadd.f32 %v644_v19, %v573_v22  ;;  %v388_v50 = vmul.f32 %v1112_v40, %v1328_v42  ;;  %v387_v51 = vmul.f32 %v1111_v43, %v1328_v42 }
  0x9b   : > { %v581_v31 = vadd.f32 %v567_v25, %v496_v24  ;;  %v580_v32 = vadd.f32 %v566_v26, %v495_v23  ;;  %v1363_v34 = vpop.permute.xlu2 %1150 }
  0x9c   : > { %v671_v35 = vmax.f32 %v657_v27, 0.0  ;;  %v672_v36 = vmax.f32 %v658_v28, 0.0  ;;  %v405_v62 = vadd.f32 %v1337_v56, %v388_v50  ;;  %v404_v63 = vadd.f32 %v1337_v56, %v387_v51 }
  0x9d   : > { %v665_v37 = vadd.f32 %v651_v30, %v580_v32  ;;  %v666_v38 = vadd.f32 %v652_v29, %v581_v31  ;;  %v1153_v18 = vunpack.i.h.bf16 %v1363_v34  ;;  %v1152_v25 = vunpack.i.l.bf16 %v1363_v34 }
  0x9e   : > { %v685_v39 = vpack.c.bf16 %v672_v36, %v671_v35  ;;  %v497_v28 = vadd.f32 %v483_v0, %v412_v16  ;;  %v498_v29 = vadd.f32 %v484_v17, %v413_v9 }
  0x9f   : > { %v1116_v44 = vpop.permute.xlu1 %1115  ;;  %v679_v45 = vmax.f32 %v665_v37, 0.0  ;;  %v680_v46 = vmax.f32 %v666_v38, 0.0  ;;  %v654_v30 = vmul.f32 %v1153_v18, %v1347_v1  ;;  %v653_v43 = vmul.f32 %v1152_v25, %v1347_v1 }
  0xa0   : > { %984 = vmatmul.msk.bf16.vlgmr.msra.gmra.mxu0 %vm712_vm0, %v685_v39  ;;  %v1118_v52 = vunpack.i.h.bf16 %v1116_v44  ;;  %v1117_v53 = vunpack.i.l.bf16 %v1116_v44  ;;  %v1140_v54 = vpop.permute.xlu0 %1139 }
  0xa1   : > { %v689_v47 = vpack.c.bf16 %v680_v46, %v679_v45  ;;  %v1142_v59 = vunpack.i.h.bf16 %v1140_v54  ;;  %v1141_v60 = vunpack.i.l.bf16 %v1140_v54 }
  0xa2   : > { %v476_v2 = vmul.f32 %v1118_v52, %v1330_v49  ;;  %v475_v3 = vmul.f32 %v1117_v53, %v1330_v49 }
  0xa3   : > { %988 = vmatmul.msk.bf16.vlgmr.msra.gmra.mxu2 %vm712_vm0, %v689_v47  ;;  %v646_v10 = vmul.f32 %v1142_v59, %v1347_v1  ;;  %v645_v11 = vmul.f32 %v1141_v60, %v1347_v1 }
  0xa4   : > { %v1371_v57 = vpop.permute.xlu2 %1162  ;;  %v489_v12 = vadd.f32 %v475_v3, %v404_v63  ;;  %v490_v13 = vadd.f32 %v476_v2, %v405_v62 }
  0xa5   : > { %v1165_v0 = vunpack.i.h.bf16 %v1371_v57  ;;  %v1164_v18 = vunpack.i.l.bf16 %v1371_v57 }
  0xa7   : > { %v478_v25 = vmul.f32 %v1165_v0, %v1330_v49 }
  0xa8   : > { %v1128_v6 = vpop.permute.xlu1 %1127 }
  0xa9   : > { %v1130_v7 = vunpack.i.h.bf16 %v1128_v6  ;;  %v1129_v8 = vunpack.i.l.bf16 %v1128_v6  ;;  %v1169_v22 = vpop.permute.xlu0 %1168 }
  0xaa   : > { %v1171_v23 = vunpack.i.h.bf16 %v1169_v22  ;;  %v1170_v24 = vunpack.i.l.bf16 %v1169_v22 }
  0xab   : > { %v561_v14 = vmul.f32 %v1130_v7, %v1343_v61  ;;  %v560_v15 = vmul.f32 %v1129_v8, %v1343_v61 }
  0xac   : > { %v1180_v19 = vpop.permute.xlu2 %1179  ;;  %v398_v39 = vmul.f32 %v1171_v23, %v1328_v42  ;;  %v397_v40 = vmul.f32 %v1170_v24, %v1328_v42 }
  0xad   : > { %v574_v20 = vadd.f32 %v560_v15, %v489_v12  ;;  %v575_v21 = vadd.f32 %v561_v14, %v490_v13  ;;  %v1182_v37 = vunpack.i.h.bf16 %v1180_v19  ;;  %v1181_v38 = vunpack.i.l.bf16 %v1180_v19 }
  0xae   : > { %v415_v52 = vadd.f32 %v1337_v56, %v398_v39  ;;  %v414_v53 = vadd.f32 %v1337_v56, %v397_v40 }
  0xaf   : > { %v659_v26 = vadd.f32 %v645_v11, %v574_v20  ;;  %v660_v27 = vadd.f32 %v646_v10, %v575_v21  ;;  %v486_v50 = vmul.f32 %v1182_v37, %v1330_v49  ;;  %v485_v51 = vmul.f32 %v1181_v38, %v1330_v49 }
  0xb0   : > { %v1145_v31 = vpop.permute.xlu1 %1144 }
  0xb1   : > { %v1147_v32 = vunpack.i.h.bf16 %v1145_v31  ;;  %v1146_v33 = vunpack.i.l.bf16 %v1145_v31  ;;  %v673_v35 = vmax.f32 %v659_v26, 0.0  ;;  %v674_v36 = vmax.f32 %v660_v27, 0.0 }
  0xb2   : > { %v1198_v60 = vpop.permute.xlu0 %1197  ;;  %v499_v3 = vadd.f32 %v485_v51, %v414_v53  ;;  %v500_v4 = vadd.f32 %v486_v50, %v415_v52  ;;  %v477_v26 = vmul.f32 %v1164_v18, %v1330_v49 }
  0xb3   : > { %v569_v34 = vmul.f32 %v1147_v32, %v1343_v61  ;;  %v568_v44 = vmul.f32 %v1146_v33, %v1343_v61  ;;  %v686_v45 = vpack.c.bf16 %v674_v36, %v673_v35  ;;  %v1200_v5 = vunpack.i.h.bf16 %v1198_v60 }
  0xb4   : > { %v1199_v8 = vunpack.i.l.bf16 %v1198_v60 }
  0xb5   : > { %v583_v46 = vadd.f32 %v569_v34, %v498_v29  ;;  %v582_v47 = vadd.f32 %v568_v44, %v497_v28  ;;  %985 = vmatmul.msk.bf16.gmra.mxu0 %vm712_vm0, %v686_v45  ;;  %v1192_v48 = vpop.permute.xlu2 %1191  ;;  %v656_v11 = vmul.f32 %v1200_v5, %v1347_v1 }
  0xb6   : > { %v1194_v58 = vunpack.i.h.bf16 %v1192_v48  ;;  %v1193_v59 = vunpack.i.l.bf16 %v1192_v48  ;;  %v655_v12 = vmul.f32 %v1199_v8, %v1347_v1 }
  0xb7   : > { %v667_v54 = vadd.f32 %v653_v43, %v582_v47  ;;  %v668_v55 = vadd.f32 %v654_v30, %v583_v46 }
  0xb8   : > { %v571_v6 = vmul.f32 %v1194_v58, %v1343_v61  ;;  %v570_v7 = vmul.f32 %v1193_v59, %v1343_v61 }
  0xb9   : > { %v1157_v62 = vpop.permute.xlu1 %1156  ;;  %v681_v63 = vmax.f32 %v667_v54, 0.0  ;;  %v682_v2 = vmax.f32 %v668_v55, 0.0 }
  0xba   : > { %v584_v9 = vadd.f32 %v570_v7, %v499_v3  ;;  %v585_v10 = vadd.f32 %v571_v6, %v500_v4  ;;  %v1159_v13 = vunpack.i.h.bf16 %v1157_v62  ;;  %v1158_v14 = vunpack.i.l.bf16 %v1157_v62 }
  0xbb   : > { %v690_v41 = vpack.c.bf16 %v682_v2, %v681_v63 }
  0xbc   : > { %v669_v16 = vadd.f32 %v655_v12, %v584_v9  ;;  %v670_v17 = vadd.f32 %v656_v11, %v585_v10  ;;  %v390_v19 = vmul.f32 %v1159_v13, %v1328_v42  ;;  %v389_v20 = vmul.f32 %v1158_v14, %v1328_v42 }
  0xbd   : > { %989 = vmatmul.msk.bf16.gmra.mxu2 %vm712_vm0, %v690_v41 }
  0xbe   : > { %v683_v23 = vmax.f32 %v669_v16, 0.0  ;;  %v684_v24 = vmax.f32 %v670_v17, 0.0  ;;  %v407_v27 = vadd.f32 %v1337_v56, %v390_v19  ;;  %v406_v28 = vadd.f32 %v1337_v56, %v389_v20  ;;  %v1210_v43 = vpop.permute.xlu2 %1209  ;;  %v1011_v16 = vld [vmem:[%s1494_s5 + $0x8] sm:$0xff]  ;;  %v1226_v17 = vld [vmem:[%s1493_s4] ss:$0 sm:$0xff] }
  0xbf   : > { %v1212_v54 = vunpack.i.h.bf16 %v1210_v43  ;;  %v1211_v55 = vunpack.i.l.bf16 %v1210_v43  ;;  %846 = vmatpush.bf16.msra.mxu1 %v1011_v16  ;;  %1048 = vmatpush.bf16.msra.mxu3 %v1011_v16 }
  0xc0   : > { %v691_v31 = vpack.c.bf16 %v684_v24, %v683_v23  ;;  %v491_v32 = vadd.f32 %v477_v26, %v406_v28  ;;  %v492_v33 = vadd.f32 %v478_v25, %v407_v27 }
  0xc1   : > { %v480_v2 = vmul.f32 %v1212_v54, %v1330_v49  ;;  %v479_v3 = vmul.f32 %v1211_v55, %v1330_v49 }
  0xc2   : > { %v1175_v15 = vpop.permute.xlu1 %1174 }
  0xc3   : > { %v1177_v21 = vunpack.i.h.bf16 %v1175_v15  ;;  %v1176_v22 = vunpack.i.l.bf16 %v1175_v15 }
  0xc5   : > { %v563_v29 = vmul.f32 %v1177_v21, %v1343_v61  ;;  %v562_v57 = vmul.f32 %v1176_v22, %v1343_v61 }
  0xc7   : > { %v576_v37 = vadd.f32 %v562_v57, %v491_v32  ;;  %v577_v38 = vadd.f32 %v563_v29, %v492_v33  ;;  %v1222_v58 = vpop.permute.xlu2 %1221 }
  0xc8   : > { %v1224_v59 = vunpack.i.h.bf16 %v1222_v58  ;;  %v1223_v60 = vunpack.i.l.bf16 %v1222_v58 }
  0xca   : > { %v650_v6 = vmul.f32 %v1224_v59, %v1347_v1 }
  0xcb   : > { %v1186_v30 = vpop.permute.xlu1 %1185 }
  0xcc   : > { %v1188_v35 = vunpack.i.h.bf16 %v1186_v30  ;;  %v1187_v36 = vunpack.i.l.bf16 %v1186_v30 }
  0xcd   : > { %990 = vmatmul.msk.bf16.gmra.mxu2 %vm712_vm0, %v691_v31 }
  0xce   : > { %v648_v39 = vmul.f32 %v1188_v35, %v1347_v1  ;;  %v647_v40 = vmul.f32 %v1187_v36, %v1347_v1 }
  0xd0   : > { %v661_v34 = vadd.f32 %v647_v40, %v576_v37  ;;  %v662_v44 = vadd.f32 %v648_v39, %v577_v38 }
  0xd2   : > { %v675_v45 = vmax.f32 %v661_v34, 0.0  ;;  %v676_v46 = vmax.f32 %v662_v44, 0.0 }
  0xd4   : > { %v1204_v47 = vpop.permute.xlu1 %1203  ;;  %v687_v48 = vpack.c.bf16 %v676_v46, %v675_v45 }
  0xd5   : > { %v1206_v50 = vunpack.i.h.bf16 %v1204_v47  ;;  %v1205_v51 = vunpack.i.l.bf16 %v1204_v47 }
  0xd6   : > { %986 = vmatmul.msk.bf16.gmra.mxu0 %vm712_vm0, %v687_v48 }
  0xd7   : > { %v392_v52 = vmul.f32 %v1206_v50, %v1328_v42  ;;  %v391_v53 = vmul.f32 %v1205_v51, %v1328_v42  ;;  %v649_v42 = vmul.f32 %v1223_v60, %v1347_v1  ;;  %v1010_v1 = vld [vmem:[%s1494_s5] sm:$0xff] }
  0xd8   : > { %847 = vmatpush.bf16.msra.mxu1 %v1010_v1  ;;  %1049 = vmatpush.bf16.msra.mxu3 %v1010_v1 }
  0xd9   : > { %v409_v62 = vadd.f32 %v1337_v56, %v392_v52  ;;  %v408_v63 = vadd.f32 %v1337_v56, %v391_v53 }
  0xdb   : > { %v493_v7 = vadd.f32 %v479_v3, %v408_v63  ;;  %v494_v8 = vadd.f32 %v480_v2, %v409_v62 }
  0xdd   : > { %v1216_v4 = vpop.permute.xlu1 %1215 }
  0xde   : > { %v1218_v5 = vunpack.i.h.bf16 %v1216_v4  ;;  %v1217_v41 = vunpack.i.l.bf16 %v1216_v4 }
  0xe0   : > { %v565_v9 = vmul.f32 %v1218_v5, %v1343_v61  ;;  %v564_v10 = vmul.f32 %v1217_v41, %v1343_v61 }
  0xe2   : > { %v578_v11 = vadd.f32 %v564_v10, %v493_v7  ;;  %v579_v12 = vadd.f32 %v565_v9, %v494_v8 }
  0xe4   : > { %v663_v56 = vadd.f32 %v649_v42, %v578_v11  ;;  %v664_v13 = vadd.f32 %v650_v6, %v579_v12  ;;  %v1227_v42 = vld [vmem:[%s1495_s6] ss:$0 sm:$0xff] }
  0xe6   : > { %v677_v14 = vmax.f32 %v663_v56, 0.0  ;;  %v678_v15 = vmax.f32 %v664_v13, 0.0 }
  0xe8   : > { %v688_v49 = vpack.c.bf16 %v678_v15, %v677_v14 }
  0xea   : > { %987 = vmatmul.msk.bf16.gmra.mxu0 %vm712_vm0, %v688_v49 }
 0x11d   : > { %v743_v61 = vpop.f32.mrf.mxu0 }
 0x11e   : > { %v744_v0 = vadd.f32 %v1226_v17, %v743_v61 }
 0x120   : > { %v778_v21 = vmax.f32 %v744_v0, 0.0 }
 0x125   : > { %v745_v18 = vpop.f32.mrf.mxu0 }
 0x126   : > { %v746_v19 = vadd.f32 %v1226_v17, %v745_v18  ;;  %v763_v20 = vpop.f32.mrf.mxu2 }
 0x127   : > { %v764_v24 = vadd.f32 %v1226_v17, %v763_v20 }
 0x128   : > { %v779_v22 = vmax.f32 %v746_v19, 0.0 }
 0x129   : > { %v786_v27 = vmax.f32 %v764_v24, 0.0 }
 0x12a   : > { %v792_v23 = vpack.c.bf16 %v779_v22, %v778_v21 }
 0x12c   : > { %999 = vmatmul.msk.bf16.vlgmr.msra.gmra.mxu1 %vm712_vm0, %v792_v23 }
 0x12e   : > { %v765_v25 = vpop.f32.mrf.mxu2 }
 0x12f   : > { %v766_v26 = vadd.f32 %v1226_v17, %v765_v25 }
 0x131   : > { %v787_v28 = vmax.f32 %v766_v26, 0.0 }
 0x132   : > { %v748_v29 = vpop.f32.mrf.mxu0 }
 0x133   : > { %v796_v57 = vpack.c.bf16 %v787_v28, %v786_v27  ;;  %v749_v30 = vadd.f32 %v1226_v17, %v748_v29 }
 0x135   : > { %1003 = vmatmul.msk.bf16.vlgmr.msra.gmra.mxu3 %vm712_vm0, %v796_v57  ;;  %v780_v33 = vmax.f32 %v749_v30, 0.0 }
 0x13a   : > { %v750_v31 = vpop.f32.mrf.mxu0 }
 0x13b   : > { %v751_v32 = vadd.f32 %v1226_v17, %v750_v31 }
 0x13d   : > { %v781_v35 = vmax.f32 %v751_v32, 0.0 }
 0x13f   : > { %v793_v36 = vpack.c.bf16 %v781_v35, %v780_v33 }
 0x140   : > { %v768_v37 = vpop.f32.mrf.mxu2 }
 0x141   : > { %1000 = vmatmul.msk.bf16.gmra.mxu1 %vm712_vm0, %v793_v36  ;;  %v769_v38 = vadd.f32 %v1226_v17, %v768_v37 }
 0x143   : > { %v788_v43 = vmax.f32 %v769_v38, 0.0 }
 0x148   : > { %v770_v39 = vpop.f32.mrf.mxu2 }
 0x149   : > { %v771_v40 = vadd.f32 %v1226_v17, %v770_v39 }
 0x14b   : > { %v789_v34 = vmax.f32 %v771_v40, 0.0 }
 0x14d   : > { %v797_v44 = vpack.c.bf16 %v789_v34, %v788_v43 }
 0x14f   : > { %1004 = vmatmul.msk.bf16.gmra.mxu3 %vm712_vm0, %v797_v44 }
 0x150   : > { %v773_v45 = vpop.f32.mrf.mxu2 }
 0x151   : > { %v774_v47 = vadd.f32 %v1226_v17, %v773_v45 }
 0x153   : > { %v753_v46 = vpop.f32.mrf.mxu0  ;;  %v790_v52 = vmax.f32 %v774_v47, 0.0 }
 0x154   : > { %v754_v51 = vadd.f32 %v1226_v17, %v753_v46 }
 0x156   : > { %v782_v59 = vmax.f32 %v754_v51, 0.0 }
 0x158   : > { %v775_v48 = vpop.f32.mrf.mxu2 }
 0x159   : > { %v776_v50 = vadd.f32 %v1226_v17, %v775_v48 }
 0x15b   : > { %v791_v53 = vmax.f32 %v776_v50, 0.0  ;;  %v755_v54 = vpop.f32.mrf.mxu0 }
 0x15c   : > { %v756_v55 = vadd.f32 %v1226_v17, %v755_v54 }
 0x15d   : > { %v798_v58 = vpack.c.bf16 %v791_v53, %v790_v52 }
 0x15e   : > { %v783_v60 = vmax.f32 %v756_v55, 0.0 }
 0x15f   : > { %1005 = vmatmul.msk.bf16.gmra.mxu3 %vm712_vm0, %v798_v58 }
 0x160   : > { %v794_v62 = vpack.c.bf16 %v783_v60, %v782_v59 }
 0x162   : > { %1001 = vmatmul.msk.bf16.gmra.mxu1 %vm712_vm0, %v794_v62 }
 0x167   : > { %v758_v63 = vpop.f32.mrf.mxu0 }
 0x168   : > { %v759_v2 = vadd.f32 %v1226_v17, %v758_v63 }
 0x16a   : > { %v784_v5 = vmax.f32 %v759_v2, 0.0 }
 0x16f   : > { %v760_v3 = vpop.f32.mrf.mxu0 }
 0x170   : > { %v761_v4 = vadd.f32 %v1226_v17, %v760_v3 }
 0x172   : > { %v785_v41 = vmax.f32 %v761_v4, 0.0 }
 0x174   : > { %v795_v6 = vpack.c.bf16 %v785_v41, %v784_v5 }
 0x176   : > { %1002 = vmatmul.msk.bf16.gmra.mxu1 %vm712_vm0, %v795_v6 }
 0x1a9   : > { %v849_v7 = vpop.f32.mrf.mxu1 }
 0x1aa   : > { %v850_v8 = vadd.f32 %v1227_v42, %v849_v7 }
 0x1ac   : > { %v884_v9 = vpack.c.bf16 %v850_v8, %v850_v8 }
 0x1ae   : > { %899 = vst.msk [vmem:[%s1456_s29] sm:$0xf] %vm898_vm1, %v884_v9 }
 0x1b1   : > { %v851_v10 = vpop.f32.mrf.mxu1 }
 0x1b2   : > { %v852_v11 = vadd.f32 %v1227_v42, %v851_v10 }
 0x1b4   : > { %v885_v12 = vpack.c.bf16 %v852_v11, %v852_v11 }
 0x1b6   : > { %900 = vst.msk [vmem:[%s1456_s29 + $0x4] sm:$0xf] %vm898_vm1, %v885_v12 }
 0x1b8   : > { %v869_v56 = vpop.f32.mrf.mxu3 }
 0x1b9   : > { %v870_v13 = vadd.f32 %v1227_v42, %v869_v56 }
 0x1bb   : > { %v892_v14 = vpack.c.bf16 %v870_v13, %v870_v13 }
 0x1bd   : > { %907 = vst.msk [vmem:[%s1456_s29 + $0x20] sm:$0xf] %vm898_vm1, %v892_v14 }
 0x1be   : > { %v854_v15 = vpop.f32.mrf.mxu1 }
 0x1bf   : > { %v855_v49 = vadd.f32 %v1227_v42, %v854_v15 }
 0x1c0   : > { %v871_v16 = vpop.f32.mrf.mxu3 }
 0x1c1   : > { %v886_v1 = vpack.c.bf16 %v855_v49, %v855_v49  ;;  %v872_v61 = vadd.f32 %v1227_v42, %v871_v16 }
 0x1c3   : > { %901 = vst.msk [vmem:[%s1456_s29 + $0x8] sm:$0xf] %vm898_vm1, %v886_v1  ;;  %v893_v17 = vpack.c.bf16 %v872_v61, %v872_v61 }
 0x1c5   : > { %908 = vst.msk [vmem:[%s1456_s29 + $0x24] sm:$0xf] %vm898_vm1, %v893_v17 }
 0x1c6   : > { %v856_v0 = vpop.f32.mrf.mxu1 }
 0x1c7   : > { %v857_v18 = vadd.f32 %v1227_v42, %v856_v0 }
 0x1c9   : > { %v887_v19 = vpack.c.bf16 %v857_v18, %v857_v18 }
 0x1cb   : > { %902 = vst.msk [vmem:[%s1456_s29 + $0xc] sm:$0xf] %vm898_vm1, %v887_v19 }
 0x1d2   : > { %v874_v20 = vpop.f32.mrf.mxu3 }
 0x1d3   : > { %v875_v21 = vadd.f32 %v1227_v42, %v874_v20 }
 0x1d5   : > { %v894_v22 = vpack.c.bf16 %v875_v21, %v875_v21 }
 0x1d7   : > { %909 = vst.msk [vmem:[%s1456_s29 + $0x28] sm:$0xf] %vm898_vm1, %v894_v22 }
 0x1da   : > { %v876_v23 = vpop.f32.mrf.mxu3 }
 0x1db   : > { %v877_v24 = vadd.f32 %v1227_v42, %v876_v23 }
 0x1dd   : > { %v895_v25 = vpack.c.bf16 %v877_v24, %v877_v24 }
 0x1df   : > { %910 = vst.msk [vmem:[%s1456_s29 + $0x2c] sm:$0xf] %vm898_vm1, %v895_v25  ;;  %v859_v26 = vpop.f32.mrf.mxu1 }
 0x1e0   : > { %v860_v27 = vadd.f32 %v1227_v42, %v859_v26 }
 0x1e2   : > { %v888_v28 = vpack.c.bf16 %v860_v27, %v860_v27  ;;  %v879_v29 = vpop.f32.mrf.mxu3 }
 0x1e3   : > { %v880_v57 = vadd.f32 %v1227_v42, %v879_v29 }
 0x1e4   : > { %903 = vst.msk [vmem:[%s1456_s29 + $0x10] sm:$0xf] %vm898_vm1, %v888_v28 }
 0x1e5   : > { %v896_v30 = vpack.c.bf16 %v880_v57, %v880_v57 }
 0x1e7   : > { %911 = vst.msk [vmem:[%s1456_s29 + $0x30] sm:$0xf] %vm898_vm1, %v896_v30  ;;  %v861_v31 = vpop.f32.mrf.mxu1 }
 0x1e8   : > { %v862_v32 = vadd.f32 %v1227_v42, %v861_v31 }
 0x1ea   : > { %v889_v33 = vpack.c.bf16 %v862_v32, %v862_v32  ;;  %v881_v35 = vpop.f32.mrf.mxu3 }
 0x1eb   : > { %v882_v36 = vadd.f32 %v1227_v42, %v881_v35 }
 0x1ec   : > { %904 = vst.msk [vmem:[%s1456_s29 + $0x14] sm:$0xf] %vm898_vm1, %v889_v33 }
 0x1ed   : > { %v897_v37 = vpack.c.bf16 %v882_v36, %v882_v36 }
 0x1ef   : > { %912 = vst.msk [vmem:[%s1456_s29 + $0x34] sm:$0xf] %vm898_vm1, %v897_v37 }
 0x1f3   : > { %v864_v38 = vpop.f32.mrf.mxu1 }
 0x1f4   : > { %v865_v39 = vadd.f32 %v1227_v42, %v864_v38 }
 0x1f6   : > { %v890_v40 = vpack.c.bf16 %v865_v39, %v865_v39 }
 0x1f8   : > { %905 = vst.msk [vmem:[%s1456_s29 + $0x18] sm:$0xf] %vm898_vm1, %v890_v40 }
 0x1fb   : > { %v866_v43 = vpop.f32.mrf.mxu1 }
 0x1fc   : > { %v867_v34 = vadd.f32 %v1227_v42, %v866_v43 }
 0x1fe   : > { %v891_v44 = vpack.c.bf16 %v867_v34, %v867_v34 }
 0x200   : > { %906 = vst.msk [vmem:[%s1456_s29 + $0x1c] sm:$0xf] %vm898_vm1, %v891_v44 }
 0x201 PF: > { %s17_s24 = sadd.s32 1, %s1234_s24  }
 0x202   : > { %p14_p4 = scmp.ge.s32.totalorder %s17_s24, 4  }
 0x204   :  { %16 = sbr.rel (!%p14_p4) target bundleno = 1 (0x1), region = 78 }

</bundles_post_ra>
